<compile_context>
chip_gen: v5e
topology: v5e:2x2
jax: 0.10.0
libtpu: 0.0.40
codegen_flags: <defaults>
</compile_context>

<pallas_src>
import math
import functools

import jax
import jax.numpy as jnp
from jax.experimental import pallas as pl
from jax.experimental.pallas import tpu as pltpu


# Fits comfortably under v5e/v6e (128 MiB) and v7x (64 MiB) physical VMEM.
_VMEM_LIMIT_BYTES = 48 * 1024 * 1024


def _pick_tile(extent: int, preferred: int) -> int:
    """`preferred` if it evenly divides `extent`, otherwise the full extent."""
    return preferred if extent % preferred == 0 else extent


# --------------------------------------------------------------------------
# Linear projection kernel: y = x @ W_t + b   (W_t is pre-transposed (D_in, D_out))
# --------------------------------------------------------------------------
def _linear_kernel(x_ref, w_ref, b_ref, o_ref):
    # Keep x/W in their input dtype (bf16-friendly); f32 accumulation on the MXU.
    acc = jnp.dot(x_ref[...], w_ref[...], preferred_element_type=jnp.float32)
    o_ref[...] = (acc + b_ref[...].astype(jnp.float32)).astype(o_ref.dtype)


def _pallas_linear(x, w_t, b, *, row_tile=256):
    rows, d_in = x.shape
    d_out = w_t.shape[1]
    tm = _pick_tile(rows, row_tile)
    return pl.pallas_call(
        _linear_kernel,
        out_shape=jax.ShapeDtypeStruct((rows, d_out), x.dtype),
        grid_spec=pltpu.PrefetchScalarGridSpec(
            num_scalar_prefetch=0,
            grid=(rows // tm,),
            in_specs=[
                pl.BlockSpec((tm, d_in), lambda i: (i, 0)),
                pl.BlockSpec((d_in, d_out), lambda i: (0, 0)),   # constant across grid
                pl.BlockSpec((1, d_out), lambda i: (0, 0)),
            ],
            out_specs=pl.BlockSpec((tm, d_out), lambda i: (i, 0)),
        ),
        compiler_params=pltpu.CompilerParams(
            dimension_semantics=("parallel",),
            vmem_limit_bytes=_VMEM_LIMIT_BYTES),
    )(x, w_t, b)


# --------------------------------------------------------------------------
# Flash-attention kernel (online softmax over the Tk grid axis)
# --------------------------------------------------------------------------
def _flash_kernel(q_ref, k_ref, v_ref, o_ref, m_sc, l_sc, acc_sc, q_sc, *,
                  n_heads: int, d_head: int):
    ki = pl.program_id(2)

    tq = q_ref.shape[1]
    tk = k_ref.shape[1]

    @pl.when(ki == 0)
    def _init():
        m_sc[...] = jnp.full_like(m_sc, -jnp.inf)
        l_sc[...] = jnp.zeros_like(l_sc)
        acc_sc[...] = jnp.zeros_like(acc_sc)
        # Split heads out of the lane dim once per (b, q-tile); cache in VMEM.
        q_sc[...] = pltpu.einshape(
            "mhd->hmd", q_ref[0].reshape(tq, n_heads, d_head))              # (H, tq, dh)

    q = q_sc[...]                                                           # (H, tq, dh)
    # K/V head split (operands stay in the input dtype until the MXU).
    k = pltpu.einshape("mhd->hmd", k_ref[0].reshape(tk, n_heads, d_head))   # (H, tk, dh)
    v = pltpu.einshape("mhd->hmd", v_ref[0].reshape(tk, n_heads, d_head))   # (H, tk, dh)

    # Batched-over-heads QK^T: contract the last axis of both (no explicit .T).
    # The 1/sqrt(d_head) scale is already folded into W_q / b_q.
    s = jnp.einsum("hqd,hkd->hqk", q, k,
                   preferred_element_type=jnp.float32)                      # (H, tq, tk) f32
    # TODO(synk): optional attention mask (mask == 0 -> -inf) not wired; forward default is mask=None.

    m_prev = m_sc[...]                                                      # (H, tq, 1)
    m_new = jnp.maximum(m_prev, jnp.max(s, axis=-1, keepdims=True))
    alpha = jnp.exp(m_prev - m_new)                                         # (H, tq, 1)
    p = jnp.exp(s - m_new)                                                  # (H, tq, tk)

    l_sc[...] = alpha * l_sc[...] + jnp.sum(p, axis=-1, keepdims=True)
    acc_sc[...] = alpha * acc_sc[...] + jnp.einsum(
        "hqk,hkd->hqd", p.astype(v.dtype), v,
        preferred_element_type=jnp.float32)                                 # (H, tq, dh)
    m_sc[...] = m_new

    @pl.when(ki == pl.num_programs(2) - 1)
    def _finalize():
        l = l_sc[...]
        inv_l = pl.reciprocal(l, approx=True)
        inv_l = inv_l * (2.0 - l * inv_l)          # one Newton step -> ~f32 accuracy
        ctx = acc_sc[...] * inv_l                  # (H, tq, dh) f32
        ctx = pltpu.einshape("hmd->mhd", ctx).reshape(tq, n_heads * d_head)
        o_ref[0] = ctx.astype(o_ref.dtype)


def _pallas_flash_attention(q, k, v, *, n_heads, q_tile=128, k_tile=128):
    B, T_q, D = q.shape
    _, T_k, _ = k.shape
    d_head = D // n_heads
    tq = _pick_tile(T_q, q_tile)
    tk = _pick_tile(T_k, k_tile)

    kernel = functools.partial(_flash_kernel, n_heads=n_heads, d_head=d_head)

    return pl.pallas_call(
        kernel,
        out_shape=jax.ShapeDtypeStruct((B, T_q, D), q.dtype),
        grid_spec=pltpu.PrefetchScalarGridSpec(
            num_scalar_prefetch=0,
            grid=(B, T_q // tq, T_k // tk),
            in_specs=[
                pl.BlockSpec((1, tq, D), lambda b, qi, ki: (b, qi, 0)),
                pl.BlockSpec((1, tk, D), lambda b, qi, ki: (b, ki, 0)),
                pl.BlockSpec((1, tk, D), lambda b, qi, ki: (b, ki, 0)),
            ],
            out_specs=pl.BlockSpec((1, tq, D), lambda b, qi, ki: (b, qi, 0)),
            scratch_shapes=[
                pltpu.VMEM((n_heads, tq, 1), jnp.float32),        # running max m
                pltpu.VMEM((n_heads, tq, 1), jnp.float32),        # running denom l
                pltpu.VMEM((n_heads, tq, d_head), jnp.float32),   # running ctx acc
                pltpu.VMEM((n_heads, tq, d_head), q.dtype),       # cached head-split Q
            ],
        ),
        compiler_params=pltpu.CompilerParams(
            dimension_semantics=("parallel", "parallel", "arbitrary"),
            vmem_limit_bytes=_VMEM_LIMIT_BYTES),
    )(q, k, v)


# --------------------------------------------------------------------------
# Module-level wrapper
# --------------------------------------------------------------------------
def prepare_mha_params(params, *, n_heads):
    """One-time weight preparation.

    Transposes weights to (D_in, D_out), reshapes biases to (1, D_out), and
    folds the 1/sqrt(d_head) attention scale into W_q / b_q so the flash
    kernel never multiplies the scores tile.
    """
    d_model = params["W_q"].shape[0]
    d_head = d_model // n_heads
    scale = 1.0 / math.sqrt(d_head)

    def prep(wn, bn, s=1.0):
        w = jnp.asarray(params[wn]) * s
        b = jnp.asarray(params[bn]) * s
        return w.T, b.reshape(1, -1)

    wq, bq = prep("W_q", "b_q", scale)
    wk, bk = prep("W_k", "b_k")
    wv, bv = prep("W_v", "b_v")
    wo, bo = prep("W_o", "b_o")
    return dict(wq=wq, bq=bq, wk=wk, bk=bk, wv=wv, bv=bv, wo=wo, bo=bo)


def multi_head_attention(query, key, value, prepared, *, n_heads,
                         q_tile=128, k_tile=128, row_tile=256):
    """query/key/value: (B, T, D). prepared: output of prepare_mha_params()."""
    B, T_q, D = query.shape
    _, T_k, _ = key.shape
    assert D % n_heads == 0

    # Input projections (row-tiled pallas linear kernel).
    Q = _pallas_linear(query.reshape(B * T_q, D), prepared["wq"], prepared["bq"],
                       row_tile=row_tile).reshape(B, T_q, D)
    K = _pallas_linear(key.reshape(B * T_k, D), prepared["wk"], prepared["bk"],
                       row_tile=row_tile).reshape(B, T_k, D)
    V = _pallas_linear(value.reshape(B * T_k, D), prepared["wv"], prepared["bv"],
                       row_tile=row_tile).reshape(B, T_k, D)

    # Flash attention (online softmax over Tk tiles).
    ctx = _pallas_flash_attention(Q, K, V, n_heads=n_heads,
                                  q_tile=q_tile, k_tile=k_tile)

    # Output projection.
    out = _pallas_linear(ctx.reshape(B * T_q, D), prepared["wo"], prepared["bo"],
                         row_tile=row_tile)
    return out.reshape(B, T_q, D)


# --------------------------------------------------------------------------
# Pure-JAX reference mirroring the PyTorch forward
# --------------------------------------------------------------------------
def _reference(query, key, value, params, *, n_heads: int):
    B, T_q, D = query.shape
    d_head = D // n_heads

    def linear(x, W, b):  # PyTorch convention: y = x @ W.T + b
        return x @ W.T + b

    Q = linear(query, params["W_q"], params["b_q"]).reshape(B, T_q, n_heads, d_head).transpose(0, 2, 1, 3)
    K = linear(key,   params["W_k"], params["b_k"]).reshape(B, -1, n_heads, d_head).transpose(0, 2, 1, 3)
    V = linear(value, params["W_v"], params["b_v"]).reshape(B, -1, n_heads, d_head).transpose(0, 2, 1, 3)
    scores = jnp.einsum("bhqd,bhkd->bhqk", Q, K) / math.sqrt(d_head)
    attn = jax.nn.softmax(scores, axis=-1)
    ctx = jnp.einsum("bhqk,bhkd->bhqd", attn, V)
    ctx = ctx.transpose(0, 2, 1, 3).reshape(B, T_q, D)
    return linear(ctx, params["W_o"], params["b_o"])


if __name__ == "__main__":
    # Small, module-consistent shapes. Tiles chosen (8) so the grid actually has
    # multiple Tq tiles and multiple Tk steps, exercising the online softmax.
    B, T_q, T_k, D, n_heads = 2, 16, 16, 32, 4

    key0 = jax.random.PRNGKey(0)
    ks = jax.random.split(key0, 12)
    bound = 1.0 / math.sqrt(D)

    params = {
        "W_q": jax.random.uniform(ks[0], (D, D), jnp.float32, -bound, bound),
        "b_q": jax.random.uniform(ks[1], (D,),   jnp.float32, -bound, bound),
        "W_k": jax.random.uniform(ks[2], (D, D), jnp.float32, -bound, bound),
        "b_k": jax.random.uniform(ks[3], (D,),   jnp.float32, -bound, bound),
        "W_v": jax.random.uniform(ks[4], (D, D), jnp.float32, -bound, bound),
        "b_v": jax.random.uniform(ks[5], (D,),   jnp.float32, -bound, bound),
        "W_o": jax.random.uniform(ks[6], (D, D), jnp.float32, -bound, bound),
        "b_o": jax.random.uniform(ks[7], (D,),   jnp.float32, -bound, bound),
    }

    query = jax.random.normal(ks[8],  (B, T_q, D), jnp.float32)
    key_t = jax.random.normal(ks[9],  (B, T_k, D), jnp.float32)
    value = jax.random.normal(ks[10], (B, T_k, D), jnp.float32)

    prepared = prepare_mha_params(params, n_heads=n_heads)
    out = multi_head_attention(query, key_t, value, prepared, n_heads=n_heads,
                               q_tile=8, k_tile=8, row_tile=8)
    out = jax.block_until_ready(out)

    ref = _reference(query, key_t, value, params, n_heads=n_heads)
    assert out.shape == (B, T_q, D)
    assert jnp.allclose(out, ref, atol=1e-4, rtol=1e-4), "mismatch vs reference"

    print("KERNEL_OK")
</pallas_src>

<mosaic_0001>
module attributes {stable_mosaic.version = 11 : i64} {
  func.func @_linear_kernel(%arg0: i32, %arg1: memref<8x32xf32, #tpu.memory_space<vmem>>, %arg2: memref<32x32xf32, #tpu.memory_space<vmem>>, %arg3: memref<1x32xf32, #tpu.memory_space<vmem>>, %arg4: memref<8x32xf32, #tpu.memory_space<vmem>>) attributes {dimension_semantics = [#tpu.dimension_semantics<parallel>], iteration_bounds = array<i64: 4>, scalar_prefetch = 0 : i64, scratch_operands = 0 : i64, tpu.core_type = #tpu.core_type<tc>, window_params = [{transform_indices = @transform_0, window_bounds = array<i64: 8, 32>}, {pipeline_mode = #tpu.pipeline_mode<synchronous>, transform_indices = @transform_1, window_bounds = array<i64: 32, 32>}, {pipeline_mode = #tpu.pipeline_mode<synchronous>, transform_indices = @transform_2, window_bounds = array<i64: 1, 32>}, {transform_indices = @transform_3, window_bounds = array<i64: 8, 32>}]} {
    %c0 = arith.constant 0 : index
    %c0_0 = arith.constant 0 : index
    %0 = vector.load %arg1[%c0, %c0_0] : memref<8x32xf32, #tpu.memory_space<vmem>>, vector<8x32xf32>
    %c0_1 = arith.constant 0 : index
    %c0_2 = arith.constant 0 : index
    %1 = vector.load %arg2[%c0_1, %c0_2] : memref<32x32xf32, #tpu.memory_space<vmem>>, vector<32x32xf32>
    %cst = arith.constant dense<0.000000e+00> : vector<8x32xf32>
    %2 = tpu.matmul %0, %1, %cst {dimension_numbers = #tpu.dot_dimension_numbers<[1], [0], [0], [1], [0, 0, 1, 1], [], []>} : vector<8x32xf32>, vector<32x32xf32>, vector<8x32xf32> -> vector<8x32xf32>
    %c0_3 = arith.constant 0 : index
    %c0_4 = arith.constant 0 : index
    %3 = vector.load %arg3[%c0_3, %c0_4] : memref<1x32xf32, #tpu.memory_space<vmem>>, vector<1x32xf32>
    %4 = vector.broadcast %3 : vector<1x32xf32> to vector<8x32xf32>
    %5 = arith.addf %2, %4 : vector<8x32xf32>
    %c0_5 = arith.constant 0 : index
    %c0_6 = arith.constant 0 : index
    %6 = vector.load %arg4[%c0_5, %c0_6] : memref<8x32xf32, #tpu.memory_space<vmem>>, vector<8x32xf32>
    tpu.vector_store %arg4[%c0_5, %c0_6], %5 {strides = array<i32>} : memref<8x32xf32, #tpu.memory_space<vmem>>, vector<8x32xf32>,
    return
  }
  func.func @transform_0(%arg0: i32) -> (i32, i32) {
    %c0_i32 = arith.constant 0 : i32
    %c0_i32_0 = arith.constant 0 : i32
    return %arg0, %c0_i32 : i32, i32
  }
  func.func @transform_1(%arg0: i32) -> (i32, i32) {
    %c0_i32 = arith.constant 0 : i32
    %c0_i32_0 = arith.constant 0 : i32
    %c0_i32_1 = arith.constant 0 : i32
    return %c0_i32, %c0_i32_0 : i32, i32
  }
  func.func @transform_2(%arg0: i32) -> (i32, i32) {
    %c0_i32 = arith.constant 0 : i32
    %c0_i32_0 = arith.constant 0 : i32
    %c0_i32_1 = arith.constant 0 : i32
    return %c0_i32, %c0_i32_0 : i32, i32
  }
  func.func @transform_3(%arg0: i32) -> (i32, i32) {
    %c0_i32 = arith.constant 0 : i32
    %c0_i32_0 = arith.constant 0 : i32
    return %arg0, %c0_i32 : i32, i32
  }
}

</mosaic_0001>

<bundles_post_ra>
// kernel: tpu_custom_call.1
= control target key start
LH: loop header
LB: loop body
LE: loop exit
PB: predicated region body
PF: predicated region fallthrough
CT: control target
= control target key end

     0   :  { %8 = vsyncpa [#allocation3], 0  ;;  %s702_s0 = inlined_call_operand.hbm [shape: f32[32,32], index: 0, kind: input, shape index: {}]   ;;  %s703_s1 = inlined_call_operand.hbm [shape: f32[32,32], index: 1, kind: input, shape index: {}]   ;;  %s704_s2 = inlined_call_operand.vmem [shape: f32[1,32], index: 2, kind: input, shape index: {}]   ;;  %s705_s3 = inlined_call_operand.hbm [shape: f32[32,32], index: 3, kind: output, shape index: {}]  }
   0x1   :  { %10 = vsyncpa [#allocation3 + $0x1], 0 }
   0x2   :  { %11 = vsyncpa [#allocation6], 0 }
   0x3   :  { %12 = vsyncpa [#allocation4], 0 }
   0x4   :  { %14 = vsyncpa [#allocation4 + $0x1], 0  ;;  %s565_s12 = smov 0   ;;  %s567_s13 = smov 0  }
   0x5   :  { %s569_s14 = smov 0   ;;  %s571_s15 = smov 0  }
   0x6 LB: > { %s130_s18 = sshll.u32 %s703_s1, 4  ;;  %s589_s19 = sadd.s32 4294967295, %s540_s15   ;;  %s540_s15 = sphi %s571_s15, %s714_s15   ;;  %s536_s14 = sphi %s569_s14, %s713_s14   ;;  %s532_s13 = sphi %s567_s13, %s712_s13   ;;  %s528_s12 = sphi %s565_s12, %s711_s12   ;;  %s131_s18 = int_to_ptr.hbm [resolvable:$true] %s130_s18 }
   0x7   : > { %p336_p0 = scmp.ge.s32.totalorder %s540_s15, 1  ;;  %p41_p1 = scmp.eq.s32.totalorder %s589_s19, 0 }
   0x8   : > { %p119_p2 = scmp.lt.s32.totalorder %s540_s15, 5  ;;  %s542_s21 = smov [#allocation5]  }
   0x9   : > { %s132_s22 = sshll.u32 %s542_s21, 4  ;;  %s543_s23 = smov 128   ;;  %s133_s22 = int_to_ptr.vmem [resolvable:$true] %s132_s22 }
   0xa   : > { %p594_p3 = pnand %p336_p0, %p119_p2  ;;  %s544_s24 = smov 8  }
   0xb   : > { %s335_s25 = sadd.s32 4294967294, %s540_s15   ;;  %s604_s26 = sadd.s32 1, %s540_s15  }
   0xc   : > { %p358_p4 = pneg %p594_p3  ;;  %s27_s27 = sadd.s32 1, %s536_s14 }
   0xd   : > { %s24_s28 = ssub.s32 %s540_s15, %s604_s26  ;;  %p34_p6 = scmp.ne.s32.totalorder %s536_s14, %s532_s13 }
   0xe   : > { %p359_p5 = pnand %p358_p4, %p41_p1  ;;  %p25_p7 = scmp.eq.s32.totalorder %s24_s28, 0 }
   0xf   : > { %p35_p8 = scmp.eq.s32.totalorder %s540_s15, 0  ;;  %p40_p9 = scmp.ne.s32.totalorder %s532_s13, %s528_s12 }
  0x10   : > { %361 = dma.hbm_to_vmem [thread:$0]  (!%p359_p5), %s131_s18, 512, %s133_s22, [#allocation6], %s543_s23, %s543_s23, %s544_s24  }
  0x11   : > { %p106_p10 = scmp.eq.s32.totalorder %s589_s19, 3  ;;  %p620_p11 = por %p41_p1, %p40_p9 }
  0x12   : > { %s616_s29 = scalar_select %p25_p7, %s536_s14, %s27_s27  }
  0x13   : > { %p624_p12 = por %p106_p10, %p34_p6  ;;  %p112_p13 = scmp.eq.s32.totalorder %s335_s25, 3 }
  0x14   : > { %p36_p0 = por %p35_p8, %p34_p6  ;;  %s149_s5 = sand.u32 1, %s536_s14  }
  0x15   : > { %p629_p2 = por %p112_p13, %p40_p9  ;;  %p371_p4 = scmp.lt.s32.totalorder %s540_s15, 4 }
  0x16   : > { %s339_s7 = sshll.u32 %s149_s5, 3  ;;  %s340_s8 = sshll.u32 %s540_s15, 3 }
  0x17   : > { %s157_s11 = scalar_lea.hbm %s702_s0, %s340_s8  ;;  %s153_s17 = scalar_lea.vmem [#allocation2], %s339_s7 }
  0x18   : > { %s159_s16 = sshll.u32 %s157_s11, 4  ;;  %s161_s18 = sshll.u32 %s153_s17, 4  ;;  %s160_s16 = int_to_ptr.hbm [resolvable:$true] %s159_s16  ;;  %s162_s18 = int_to_ptr.vmem [resolvable:$true] %s161_s18 }
  0x19   : > { %p638_p5 = pnand %p371_p4, %p36_p0  ;;  %s150_s22 = scalar_lea.sflag [#allocation3], %s149_s5 }
  0x1a   : > { %s440_s23 = sshra.s32 %s160_s16, 4  ;;  %s447_s28 = scalar_lea.hbm %s702_s0, 32  ;;  %s441_s23 = int_to_ptr.hbm [resolvable:$true] %s440_s23 }
  0x1b   : > { %s442_s24 = scalar_lea.hbm %s441_s23, 8  ;;  %p444_p7 = pneg %p638_p5 }
  0x1c   : > { %p443_p6 = scmp.ne.s32.totalorder %s441_s23, %s442_s24  ;;  %p448_p10 = scmp.lt.s32.totalorder %s441_s23, %s702_s0 }
  0x1d   : > { %p449_p13 = scmp.lt.s32.totalorder %s447_s28, %s442_s24 }
  0x1e   : > { %p445_p8 = pnand %p444_p7, %p443_p6 }
  0x1f   : > { %p450_p0 = por %p449_p13, %p448_p10 }
  0x20   : > { %p446_p9 = pneg %p445_p8 }
  0x22   : > { %p451_p4 = pnand %p450_p0, %p446_p9 }
  0x24   : > { %454 = shalt.err (!%p451_p4)
}
  0x25   : > { %365 = dma.hbm_to_vmem [thread:$0]  (!%p638_p5), %s160_s16, 128, %s162_s18, %s150_s22  }
  0x26   : > { %170 = sbr.rel (%p594_p3) target bundleno = 185 (0xb9), region = 32  ;;  %s655_s5 = sand.u32 (!%p594_p3), 1, %s532_s13  }
  0x27   : > { %s342_s9 = sshll.u32 (!%p594_p3), %s655_s5, 3  ;;  %s173_s10 = scalar_lea.sflag (!%p594_p3), [#allocation3], %s655_s5 }
  0x28   : > { %s176_s11 = scalar_lea.vmem (!%p594_p3), [#allocation2], %s342_s9 }
  0x2b   : > { %515 = dma.done.wait (%p620_p11), %s173_s10, 128  }
  0x2c   : > { %517 = vsyncadd (%p620_p11), %s173_s10, 4294967168 }
  0x2d   : > { %519 = dma.done.wait (%p41_p1), [#allocation6], 512  }
  0x2e   : > { %521 = vsyncadd (%p41_p1), [#allocation6], 4294966784  ;;  %v209_v0 = vld [vmem:[#allocation5 + $0x18] sm:$0xff]  ;;  %v208_v1 = vld [vmem:[#allocation5 + $0x10] sm:$0xff]  ;;  %vm214_vm0 = vcmask 261120   ;;  %s347_s20 = sshll.u32 %s589_s19, 3 }
  0x2f   : > { %230 = vmatpush.msra.mxu0 %v209_v0  ;;  %v207_v2 = vld [vmem:[#allocation5 + $0x8] sm:$0xff]  ;;  %v206_v3 = vld [vmem:[#allocation5] sm:$0xff]  ;;  %v205_v4 = vld [vmem:[%s176_s11] sm:$0xff]  ;;  %s250_s17 = scalar_lea.hbm %s705_s3, %s347_s20  ;;  %s204_s22 = scalar_lea.vmem [#allocation7], %s342_s9 }
  0x30   : > { %v409_v5 = vld [vmem:[%s704_s2] ss:$0 sm:$0xff]  ;;  %s252_s23 = sshll.u32 %s204_s22, 4  ;;  %s254_s24 = sshll.u32 %s250_s17, 4  ;;  %s253_s23 = int_to_ptr.vmem [resolvable:$true] %s252_s23  ;;  %s255_s24 = int_to_ptr.hbm [resolvable:$true] %s254_s24 }
  0x31   : > { %231 = vmatpush.msra.mxu0 %v208_v1  ;;  %s240_s25 = scalar_lea.sflag [#allocation4], %s655_s5  ;;  %s484_s27 = sshra.s32 %s255_s24, 4  ;;  %s485_s27 = int_to_ptr.hbm [resolvable:$true] %s484_s27 }
  0x32   : > { %s486_s19 = scalar_lea.hbm %s485_s27, 8  ;;  %s490_s8 = scalar_lea.hbm %s705_s3, 32 }
  0x33   : > { %232 = vmatpush.msra.mxu0 %v207_v2  ;;  %p487_p1 = scmp.ne.s32.totalorder %s485_s27, %s486_s19  ;;  %p491_p5 = scmp.lt.s32.totalorder %s485_s27, %s705_s3 }
  0x34   : > { %p492_p6 = scmp.lt.s32.totalorder %s490_s8, %s486_s19 }
  0x35   : > { %233 = vmatpush.msra.mxu0 %v206_v3  ;;  %p488_p3 = pnand %p487_p1, %p624_p12 }
  0x36   : > { %345 = vmatmul.msk.f32.vlgmr.msra.gmra.mxu0 %vm214_vm0, %v205_v4  ;;  %p493_p7 = por %p492_p6, %p491_p5 }
  0x37   : > { %p489_p11 = pneg %p488_p3 }
  0x39   : > { %p494_p8 = pnand %p493_p7, %p489_p11 }
  0xb3   : > { %v235_v6 = vpop.f32.mrf.mxu0 }
  0xb4   : > { %v236_v7 = vadd.f32 %v409_v5, %v235_v6 }
  0xb6   : > { %238 = vst.msk [vmem:[%s204_s22] sm:$0xff] %vm214_vm0, %v236_v7 }
  0xb7   : > { %497 = shalt.err (!%p494_p8)
}
  0xb8   : > { %356 = dma.vmem_to_hbm [thread:$0]  (%p624_p12), %s253_s23, 128, %s255_s24, %s240_s25  }
  0xb9 PF: > { %p373_p9 = scmp.ge.s32.totalorder %s540_s15, 2  ;;  %s266_s5 = sand.u32 1, %s528_s12  }
  0xba   : > { %s267_s11 = scalar_lea.sflag [#allocation4], %s266_s5 }
  0xbb   : > { %p367_p10 = pnand %p373_p9, %p629_p2 }
  0xbd   : > { %p368_p13 = pneg %p367_p10 }
  0xbf   : > { %523 = dma.done.wait (%p368_p13), %s267_s11, 128  }
  0xc0   : > { %525 = vsyncadd (%p368_p13), %s267_s11, 4294967168  ;;  %p17_p0 = scmp.ge.s32.totalorder %s604_s26, 6   ;;  %s711_s12 = smov %s532_s13 }
  0xc1   : > { %s712_s13 = smov %s536_s14  ;;  %s713_s14 = smov %s616_s29 }
  0xc2   : > { %s714_s15 = smov %s604_s26  ;;  %19 = sbr.rel (!%p17_p0) target bundleno = 6 (0x6), region = 81 }
  0xc7   :  { %273 = vsyncpa [#allocation3], 1 }
  0xc8   :  { %275 = vsyncpa [#allocation3 + $0x1], 1 }
  0xc9   :  { %276 = vsyncpa [#allocation6], 1 }
  0xca   :  { %277 = vsyncpa [#allocation4], 1 }
  0xcb   :  { %279 = vsyncpa [#allocation4 + $0x1], 1 }

</bundles_post_ra>
